<compile_context>
chip_gen: v5e
topology: v5e:2x2
jax: 0.10.0
libtpu: 0.0.40
codegen_flags: <defaults>
</compile_context>

<pallas_src>
import functools
import math

import jax
import jax.numpy as jnp
from jax.experimental import pallas as pl
from jax.experimental.pallas import tpu as pltpu


def _attn_pool_kernel(*refs, num_heads, has_mask):
    if has_mask:
        x_ref, mask_ref, kq_ref, wvo_ref, o_ref = refs
    else:
        x_ref, kq_ref, wvo_ref, o_ref = refs
        mask_ref = None

    tb, n, e = x_ref.shape
    nh = num_heads

    x = x_ref[...]                      # [TB, N, E], native dtype (no f32 cast)
    x2 = x.reshape(tb * n, e)           # flatten batch tile for the projection

    # scores = (x @ w_k[h]) @ q[h]^T / sqrt(D), with q and the scale pre-folded
    # into kq -> a single lane-dense matmul instead of NH K-projections.
    s = jnp.dot(x2, kq_ref[...], preferred_element_type=jnp.float32)  # [TB*N, NH]
    s = jnp.swapaxes(s.reshape(tb, n, nh), 1, 2)                      # [TB, NH, N] f32

    if mask_ref is not None:
        m = mask_ref[...].astype(jnp.float32)                         # [TB, 1, N]
        s = s * m + (-100000000.0) * (1.0 - m)                        # bcast over NH

    # Softmax over the key axis (last dim), f32 math.
    s = s - jnp.max(s, axis=-1, keepdims=True)
    p = jnp.exp(s)
    inv = pl.reciprocal(jnp.sum(p, axis=-1, keepdims=True), approx=True)
    attn = p * inv                                                    # [TB, NH, N]

    # pooled[b, h, :] = sum_n attn[b, h, n] * x[b, n, :]   (canonical batched matmul)
    a = attn if x.dtype == jnp.float32 else attn.astype(x.dtype)
    pooled = jnp.einsum('bhn,bne->bhe', a, x,
                        preferred_element_type=jnp.float32)           # [TB, NH, E]
    pooled = pooled.reshape(tb, nh * e)
    if x.dtype != jnp.float32:
        pooled = pooled.astype(x.dtype)

    # Output projection with w_v @ w_o pre-folded: [TB, NH*E] @ [NH*E, E].
    out = jnp.dot(pooled, wvo_ref[...], preferred_element_type=jnp.float32)
    o_ref[...] = out.astype(o_ref.dtype)


def attention_pooling(x, w_k, w_v, w_o, q, mask=None, *, batch_tile=8):
    """Pallas AttentionPooling forward.  x: [B, N, E] -> [B, E]."""
    B, N, E = x.shape
    NH, _, D = w_k.shape

    # Algebraic weight folds (tiny matmuls, done once per call in plain XLA).
    kq = jnp.einsum('hed,hd->eh', w_k.astype(jnp.float32),
                    q[:, 0, :].astype(jnp.float32)) * (1.0 / math.sqrt(D))
    wvo = jnp.einsum('hed,hdf->hef', w_v.astype(jnp.float32),
                     w_o.astype(jnp.float32)).reshape(NH * E, E)
    kq = kq.astype(x.dtype)
    wvo = wvo.astype(x.dtype)
    # TODO(synk): for very large NH*E*E the wvo fold should fall back to a
    # stacked [E, NH*D] V projection to bound VMEM (esp. on v7x's 64 MiB).

    # Batch tiling: TB rows per grid step; pad B to a multiple of TB.
    tb = max(1, min(batch_tile, B))
    b_pad = ((B + tb - 1) // tb) * tb
    if mask is not None:
        mask = mask.astype(x.dtype)
    if b_pad != B:
        x = jnp.pad(x, ((0, b_pad - B), (0, 0), (0, 0)))
        if mask is not None:
            mask = jnp.pad(mask, ((0, b_pad - B), (0, 0), (0, 0)),
                           constant_values=1)

    has_mask = mask is not None
    kernel = functools.partial(_attn_pool_kernel, num_heads=NH,
                               has_mask=has_mask)

    in_specs = [pl.BlockSpec((tb, N, E), lambda b: (b, 0, 0))]        # x tile
    args = [x]
    if has_mask:
        in_specs.append(pl.BlockSpec((tb, 1, N), lambda b: (b, 0, 0)))  # mask tile
        args.append(mask)
    in_specs += [
        pl.BlockSpec((E, NH), lambda b: (0, 0)),          # kq  (grid-invariant)
        pl.BlockSpec((NH * E, E), lambda b: (0, 0)),      # wvo (grid-invariant)
    ]
    args += [kq, wvo]

    out = pl.pallas_call(
        kernel,
        out_shape=jax.ShapeDtypeStruct((b_pad, E), x.dtype),
        grid_spec=pltpu.PrefetchScalarGridSpec(
            num_scalar_prefetch=0,
            grid=(b_pad // tb,),
            in_specs=in_specs,
            out_specs=pl.BlockSpec((tb, E), lambda b: (b, 0)),
        ),
        compiler_params=pltpu.CompilerParams(
            dimension_semantics=("parallel",)),
    )(*args)
    return out[:B]


def attention_pooling_ref(x, w_k, w_v, w_o, q, mask=None):
    """Pure-JAX reference mirroring the PyTorch forward exactly."""
    D = w_k.shape[-1]
    v = jnp.einsum('blj,njd->bnld', x, w_v)
    k = jnp.einsum('blj,njd->bnld', x, w_k)
    score = jnp.einsum('nij,bnkj->bnik', q, k) / math.sqrt(D)
    if mask is not None:
        m = mask[:, None]
        score = score * m + (-100000000.0) * (1.0 - m)
    score = jax.nn.softmax(score, axis=-1)
    out = jnp.einsum('bnij,bnjk->bnik', score, v)
    out = jnp.einsum('bnlj,njk->blk', out, w_o)
    return out[:, 0]


def _xavier_normal(key, shape):
    # torch.nn.init.xavier_normal_ fan computation for >2-D tensors.
    receptive = 1
    for s in shape[2:]:
        receptive *= s
    fan_in = shape[1] * receptive
    fan_out = shape[0] * receptive
    std = math.sqrt(2.0 / (fan_in + fan_out))
    return std * jax.random.normal(key, shape, jnp.float32)


if __name__ == "__main__":
    # Small deterministic config: embed_dim=32, num_heads=4, latent_dim=16.
    B, N, E = 2, 8, 32
    NH, D = 4, 16

    key = jax.random.PRNGKey(0)
    kx, kk, kv, ko, kq = jax.random.split(key, 5)

    x = jax.random.normal(kx, (B, N, E), jnp.float32)
    w_k = _xavier_normal(kk, (NH, E, D))
    w_v = _xavier_normal(kv, (NH, E, D))
    w_o = _xavier_normal(ko, (NH, D, E))
    q = _xavier_normal(kq, (NH, 1, D))

    # mask [B, 1, N]: mask out the last two positions of the second batch item.
    mask = jnp.ones((B, 1, N), jnp.float32).at[1, 0, -2:].set(0.0)

    # TODO(synk): dropout is nn.Identity at inference (dropout=None); training-mode
    # dropout on the attention weights is not implemented in the kernel.

    # Tolerance 1e-3 accounts for the EUP approximate reciprocal in the softmax
    # normalization and the f32 reassociation from the q / w_v@w_o weight folds.
    tol = dict(atol=1e-3, rtol=1e-3)

    # Masked path.
    out = jax.block_until_ready(attention_pooling(x, w_k, w_v, w_o, q, mask))
    ref = attention_pooling_ref(x, w_k, w_v, w_o, q, mask)
    assert out.shape == (B, E), out.shape
    assert jnp.allclose(out, ref, **tol), (
        f"masked: max abs err = {jnp.max(jnp.abs(out - ref))}")

    # Unmasked path (specialized variant: no mask input at all).
    out_nm = jax.block_until_ready(attention_pooling(x, w_k, w_v, w_o, q, None))
    ref_nm = attention_pooling_ref(x, w_k, w_v, w_o, q, None)
    assert jnp.allclose(out_nm, ref_nm, **tol), (
        f"unmasked: max abs err = {jnp.max(jnp.abs(out_nm - ref_nm))}")

    print("KERNEL_OK")
</pallas_src>

<mosaic_0001>
module attributes {stable_mosaic.version = 11 : i64} {
  func.func @_attn_pool_kernel(%arg0: i32, %arg1: memref<2x8x32xf32, #tpu.memory_space<vmem>>, %arg2: memref<2x1x8xf32, #tpu.memory_space<vmem>>, %arg3: memref<32x4xf32, #tpu.memory_space<vmem>>, %arg4: memref<128x32xf32, #tpu.memory_space<vmem>>, %arg5: memref<2x32xf32, #tpu.memory_space<vmem>>) attributes {dimension_semantics = [#tpu.dimension_semantics<parallel>], iteration_bounds = array<i64: 1>, scalar_prefetch = 0 : i64, scratch_operands = 0 : i64, tpu.core_type = #tpu.core_type<tc>, window_params = [{transform_indices = @transform_0, window_bounds = array<i64: 2, 8, 32>}, {transform_indices = @transform_1, window_bounds = array<i64: 2, 1, 8>}, {pipeline_mode = #tpu.pipeline_mode<synchronous>, transform_indices = @transform_2, window_bounds = array<i64: 32, 4>}, {pipeline_mode = #tpu.pipeline_mode<synchronous>, transform_indices = @transform_3, window_bounds = array<i64: 128, 32>}, {transform_indices = @transform_4, window_bounds = array<i64: 2, 32>}]} {
    %c0 = arith.constant 0 : index
    %c0_0 = arith.constant 0 : index
    %c0_1 = arith.constant 0 : index
    %0 = vector.load %arg1[%c0, %c0_0, %c0_1] : memref<2x8x32xf32, #tpu.memory_space<vmem>>, vector<2x8x32xf32>
    %1 = vector.shape_cast %0 : vector<2x8x32xf32> to vector<16x32xf32>
    %c0_2 = arith.constant 0 : index
    %c0_3 = arith.constant 0 : index
    %2 = vector.load %arg3[%c0_2, %c0_3] : memref<32x4xf32, #tpu.memory_space<vmem>>, vector<32x4xf32>
    %cst = arith.constant dense<0.000000e+00> : vector<16x4xf32>
    %3 = tpu.matmul %1, %2, %cst {dimension_numbers = #tpu.dot_dimension_numbers<[1], [0], [0], [1], [0, 0, 1, 1], [], []>} : vector<16x32xf32>, vector<32x4xf32>, vector<16x4xf32> -> vector<16x4xf32>
    %4 = vector.shape_cast %3 : vector<16x4xf32> to vector<2x8x4xf32>
    %5 = tpu.transpose %4, [0, 2, 1] : vector<2x8x4xf32> -> vector<2x4x8xf32>
    %c0_4 = arith.constant 0 : index
    %c0_5 = arith.constant 0 : index
    %c0_6 = arith.constant 0 : index
    %6 = vector.load %arg2[%c0_4, %c0_5, %c0_6] : memref<2x1x8xf32, #tpu.memory_space<vmem>>, vector<2x1x8xf32>
    %7 = vector.broadcast %6 : vector<2x1x8xf32> to vector<2x4x8xf32>
    %8 = arith.mulf %5, %7 : vector<2x4x8xf32>
    %cst_7 = arith.constant 1.000000e+00 : f32
    %9 = vector.broadcast %cst_7 : f32 to vector<2x1x8xf32>
    %10 = arith.subf %9, %6 : vector<2x1x8xf32>
    %cst_8 = arith.constant -1.000000e+08 : f32
    %11 = vector.broadcast %cst_8 : f32 to vector<2x1x8xf32>
    %12 = arith.mulf %11, %10 : vector<2x1x8xf32>
    %13 = vector.broadcast %12 : vector<2x1x8xf32> to vector<2x4x8xf32>
    %14 = arith.addf %8, %13 : vector<2x4x8xf32>
    %cst_9 = arith.constant dense<0xFF800000> : vector<2x4xf32>
    %15 = vector.multi_reduction <maximumf>, %14, %cst_9 [2] : vector<2x4x8xf32> to vector<2x4xf32>
    %16 = vector.shape_cast %15 : vector<2x4xf32> to vector<2x4x1xf32>
    %17 = vector.broadcast %16 : vector<2x4x1xf32> to vector<2x4x8xf32>
    %18 = arith.subf %14, %17 : vector<2x4x8xf32>
    %19 = math.exp %18 : vector<2x4x8xf32>
    %cst_10 = arith.constant dense<0.000000e+00> : vector<2x4xf32>
    %20 = vector.multi_reduction <add>, %19, %cst_10 [2] : vector<2x4x8xf32> to vector<2x4xf32>
    %21 = vector.shape_cast %20 : vector<2x4xf32> to vector<2x4x1xf32>
    %22 = tpu.reciprocal %21 {approx = true} : vector<2x4x1xf32> -> vector<2x4x1xf32>
    %23 = vector.broadcast %22 : vector<2x4x1xf32> to vector<2x4x8xf32>
    %24 = arith.mulf %19, %23 : vector<2x4x8xf32>
    "tpu.trace_start"() <{level = 10 : i32, message = "bhn,bne->bhe"}> : () -> ()
    %cst_11 = arith.constant dense<0.000000e+00> : vector<2x4x32xf32>
    %25 = tpu.matmul %24, %0, %cst_11 {dimension_numbers = #tpu.dot_dimension_numbers<[2], [1], [1], [2], [0, 0, 0, 1, 1, 2], [0], [0]>} : vector<2x4x8xf32>, vector<2x8x32xf32>, vector<2x4x32xf32> -> vector<2x4x32xf32>
    "tpu.trace_stop"() : () -> ()
    %26 = vector.shape_cast %25 : vector<2x4x32xf32> to vector<2x128xf32>
    %c0_12 = arith.constant 0 : index
    %c0_13 = arith.constant 0 : index
    %27 = vector.load %arg4[%c0_12, %c0_13] : memref<128x32xf32, #tpu.memory_space<vmem>>, vector<128x32xf32>
    %cst_14 = arith.constant dense<0.000000e+00> : vector<2x32xf32>
    %28 = tpu.matmul %26, %27, %cst_14 {dimension_numbers = #tpu.dot_dimension_numbers<[1], [0], [0], [1], [0, 0, 1, 1], [], []>} : vector<2x128xf32>, vector<128x32xf32>, vector<2x32xf32> -> vector<2x32xf32>
    %c0_15 = arith.constant 0 : index
    %c0_16 = arith.constant 0 : index
    %29 = vector.load %arg5[%c0_15, %c0_16] : memref<2x32xf32, #tpu.memory_space<vmem>>, vector<2x32xf32>
    tpu.vector_store %arg5[%c0_15, %c0_16], %28 {strides = array<i32>} : memref<2x32xf32, #tpu.memory_space<vmem>>, vector<2x32xf32>,
    return
  }
  func.func @transform_0(%arg0: i32) -> (i32, i32, i32) {
    %c0_i32 = arith.constant 0 : i32
    %c0_i32_0 = arith.constant 0 : i32
    %c0_i32_1 = arith.constant 0 : i32
    return %arg0, %c0_i32, %c0_i32_0 : i32, i32, i32
  }
  func.func @transform_1(%arg0: i32) -> (i32, i32, i32) {
    %c0_i32 = arith.constant 0 : i32
    %c0_i32_0 = arith.constant 0 : i32
    %c0_i32_1 = arith.constant 0 : i32
    return %arg0, %c0_i32, %c0_i32_0 : i32, i32, i32
  }
  func.func @transform_2(%arg0: i32) -> (i32, i32) {
    %c0_i32 = arith.constant 0 : i32
    %c0_i32_0 = arith.constant 0 : i32
    %c0_i32_1 = arith.constant 0 : i32
    return %c0_i32, %c0_i32_0 : i32, i32
  }
  func.func @transform_3(%arg0: i32) -> (i32, i32) {
    %c0_i32 = arith.constant 0 : i32
    %c0_i32_0 = arith.constant 0 : i32
    %c0_i32_1 = arith.constant 0 : i32
    return %c0_i32, %c0_i32_0 : i32, i32
  }
  func.func @transform_4(%arg0: i32) -> (i32, i32) {
    %c0_i32 = arith.constant 0 : i32
    %c0_i32_0 = arith.constant 0 : i32
    return %arg0, %c0_i32 : i32, i32
  }
}

</mosaic_0001>

<bundles_post_ra>
// kernel: tpu_custom_call.1
= control target key start
LH: loop header
LB: loop body
LE: loop exit
PB: predicated region body
PF: predicated region fallthrough
CT: control target
= control target key end

     0   :  { %s476_s0 = inlined_call_operand.vmem [shape: f32[2,8,32], index: 0, kind: input, shape index: {}]   ;;  %s477_s1 = inlined_call_operand.vmem [shape: f32[2,1,8], index: 1, kind: input, shape index: {}]   ;;  %s478_s2 = inlined_call_operand.vmem [shape: f32[32,4], index: 2, kind: input, shape index: {}]   ;;  %s479_s3 = inlined_call_operand.vmem [shape: f32[128,32], index: 3, kind: input, shape index: {}]   ;;  %s480_s4 = inlined_call_operand.hbm [shape: f32[2,32], index: 4, kind: output, shape index: {}]  }
   0x1   :  { %v23_v0 = vld [vmem:[%s478_s2 + $0x18] sm:$0xff]  ;;  %v22_v1 = vld [vmem:[%s478_s2 + $0x10] sm:$0xff]  ;;  %v18_v2 = vld [vmem:[%s476_s0] sm:$0xff] }
   0x2   :  { %43 = vmatpush.msra.mxu0 %v23_v0  ;;  %v19_v3 = vld [vmem:[%s476_s0 + $0x8] sm:$0xff]  ;;  %182 = vmatpush.msra.mxu1 %v18_v2 }
   0x3   :  { %v21_v4 = vld [vmem:[%s478_s2 + $0x8] sm:$0xff]  ;;  %205 = vmatpush.msra.mxu2 %v19_v3 }
   0x4   :  { %9 = vsyncpa [#allocation3], 0  ;;  %44 = vmatpush.msra.mxu0 %v22_v1  ;;  %v20_v5 = vld [vmem:[%s478_s2] sm:$0xff]  ;;  %vm24_vm0 = vcmask 261120   ;;  %vm140_vm1 = vcmask 60416   ;;  %vm163_vm2 = vcmask 64512  }
   0x5   :  { %v119_v8 = vld [vmem:[%s477_s1 + $0x1] sm:$0x1]  ;;  %v118_v11 = vld [vmem:[%s477_s1] sm:$0x1]  ;;  %v267_v42 = vld [vmem:[%s479_s3 + $0x78] sm:$0xff]  ;;  %vm219_vm3 = vcmask 1047556  }
   0x6   :  { %45 = vmatpush.msra.mxu0 %v21_v4  ;;  %v129_v9 = vsub.f32 1.0, %v119_v8  ;;  %v317_v12 = vld [vmem:[%s477_s1 + $0x1] ss:$0 sm:$0xff]  ;;  %v128_v14 = vsub.f32 1.0, %v118_v11  ;;  %v318_v20 = vld [vmem:[%s477_s1] ss:$0 sm:$0xff]  ;;  %268 = vmatpush.msra.mxu3 %v267_v42 }
   0x7   :  { %v266_v43 = vld [vmem:[%s479_s3 + $0x70] sm:$0xff]  ;;  %v265_v44 = vld [vmem:[%s479_s3 + $0x68] sm:$0xff]  ;;  %v353_v45 = vmov 1983009808   ;;  %v354_v48 = vmov 1934713408  }
   0x8   :  { %46 = vmatpush.msra.mxu0 %v20_v5  ;;  %v131_v10 = vmul.f32 -1e+08, %v129_v9  ;;  %v130_v18 = vmul.f32 -1e+08, %v128_v14  ;;  %269 = vmatpush.msra.mxu3 %v266_v43  ;;  %v211_v46 = vunpack.c.l.s4 %v353_v45  ;;  %v224_v49 = vunpack.c.l.s4 %v354_v48  ;;  %s355_s12 = smov 64   ;;  %s356_s13 = smov 32  }
   0x9   :  { %306 = vmatmul.msk.f32.vlgmr.msra.gmra.mxu0 %vm24_vm0, %v18_v2  ;;  %s357_s14 = smov 96   ;;  %v264_v1 = vld [vmem:[%s479_s3 + $0x60] sm:$0xff]  ;;  %v263_v2 = vld [vmem:[%s479_s3 + $0x58] sm:$0xff]  ;;  %v261_v4 = vld [vmem:[%s479_s3 + $0x48] sm:$0xff]  ;;  %vm248_vm4 = vcmask 523264   ;;  %vm250_vm5 = vcmask 785408  }
   0xa   :  { %v135_v13 = vperm.slane %v131_v10, 0  ;;  %v134_v21 = vperm.slane %v130_v18, 0  ;;  %270 = vmatpush.msra.mxu3 %v265_v44  ;;  %v212_v47 = vunpack.c.0.s8 %v211_v46  ;;  %v225_v53 = vunpack.c.0.s8 %v224_v49  ;;  %v260_v5 = vld [vmem:[%s479_s3 + $0x40] sm:$0xff]  ;;  %v257_v8 = vld [vmem:[%s479_s3 + $0x28] sm:$0xff]  ;;  %v255_v10 = vld [vmem:[%s479_s3 + $0x18] sm:$0xff]  ;;  %s297_s16 = sshll.u32 %s480_s4, 4  ;;  %s298_s16 = int_to_ptr.hbm [resolvable:$true] %s297_s16 }
   0xb   :  { %v256_v9 = vld [vmem:[%s479_s3 + $0x20] sm:$0xff]  ;;  %v254_v11 = vld [vmem:[%s479_s3 + $0x10] sm:$0xff]  ;;  %vm288_vm6 = vcmask 254976  }
   0xc   :  { %271 = vmatpush.msra.mxu3 %v264_v1 }
   0xe   :  { %272 = vmatpush.msra.mxu3 %v263_v2 }
  0x11   :  { %307 = vmatmul.msk.f32.gmra.mxu0 %vm24_vm0, %v19_v3  ;;  %v262_v3 = vld [vmem:[%s479_s3 + $0x50] sm:$0xff] }
  0x12   :  { %273 = vmatpush.msra.mxu3 %v262_v3 }
  0x14   :  { %274 = vmatpush.msra.mxu3 %v261_v4 }
  0x16   :  { %275 = vmatpush.msra.mxu3 %v260_v5 }
  0x86   :  { %v48_v6 = vpop.f32.mrf.mxu0 }
  0x8e   :  { %v51_v7 = vpop.f32.mrf.mxu0 }
  0x8f   :  { %86 = vxpose.xlu0.b32.start.end [1/1] (short) (narrow) %v51_v7, 8  ;;  %v258_v7 = vld [vmem:[%s479_s3 + $0x30] sm:$0xff] }
  0x97   :  { %54 = vxpose.xlu0.b32.start.end [1/1] (short) (narrow) %v48_v6, 8  ;;  %v259_v6 = vld [vmem:[%s479_s3 + $0x38] sm:$0xff] }
  0x98   :  { %276 = vmatpush.msra.mxu3 %v259_v6 }
  0x9a   :  { %277 = vmatpush.msra.mxu3 %v258_v7 }
  0x9c   :  { %278 = vmatpush.msra.mxu3 %v257_v8 }
  0x9e   :  { %279 = vmatpush.msra.mxu3 %v256_v9 }
  0xa0   :  { %280 = vmatpush.msra.mxu3 %v255_v10 }
  0xa2   :  { %281 = vmatpush.msra.mxu3 %v254_v11 }
 0x133   :  { %v102_v15 = vpop.trf.xlu0 }
 0x134   :  { %v127_v16 = vmul.f32 %v317_v12, %v102_v15  ;;  %v253_v12 = vld [vmem:[%s479_s3 + $0x8] sm:$0xff] }
 0x135   :  { %282 = vmatpush.msra.mxu3 %v253_v12 }
 0x136   :  { %v139_v17 = vadd.f32 %v135_v13, %v127_v16  ;;  %v252_v13 = vld [vmem:[%s479_s3] sm:$0xff] }
 0x137   :  { %283 = vmatpush.msra.mxu3 %v252_v13 }
 0x138   :  { %v144_v19 = vsel %vm140_vm1, %v139_v17, -inf }
 0x139   :  { %145 = vmax.xlane.f32.xlu1 %v144_v19 }
 0x13b   :  { %v70_v22 = vpop.trf.xlu0 }
 0x13c   :  { %v126_v23 = vmul.f32 %v318_v20, %v70_v22 }
 0x13e   :  { %v138_v24 = vadd.f32 %v134_v21, %v126_v23 }
 0x140   :  { %v141_v25 = vsel %vm140_vm1, %v138_v24, -inf }
 0x141   :  { %142 = vmax.xlane.f32.xlu1 %v141_v25 }
 0x1ac   :  { %v146_v26 = vpop.xlane.xlu1 %145 }
 0x1ad   :  { %v148_v27 = vsub.f32 %v139_v17, %v146_v26 }
 0x1af   :  { %v151_v28 = vmul.f32 1.442695, %v148_v27 }
 0x1b1   :  { %319 = vpow2.f32 %v151_v28 }
 0x1b4   :  { %v143_v29 = vpop.xlane.xlu1 %142 }
 0x1b5   :  { %v147_v30 = vsub.f32 %v138_v24, %v143_v29 }
 0x1b7   :  { %v320_v31 = vpop.eup %319  ;;  %v149_v32 = vmul.f32 1.442695, %v147_v30 }
 0x1b8   :  { %v156_v33 = vsel %vm140_vm1, %v320_v31, 0.0 }
 0x1b9   :  { %321 = vpow2.f32 %v149_v32  ;;  %157 = vadd.xlane.f32.xlu2 %v156_v33 }
 0x1bf   :  { %v322_v34 = vpop.eup %321 }
 0x1c0   :  { %v153_v35 = vsel %vm140_vm1, %v322_v34, 0.0 }
 0x1c1   :  { %154 = vadd.xlane.f32.xlu2 %v153_v35 }
 0x22c   :  { %v158_v36 = vpop.xlane.xlu2 %157 }
 0x22d   :  { %323 = vrcp.f32 %v158_v36 }
 0x233   :  { %v324_v37 = vpop.eup %323 }
 0x234   :  { %v155_v38 = vpop.xlane.xlu2 %154  ;;  %v162_v39 = vmul.f32 %v324_v37, %v320_v31 }
 0x235   :  { %325 = vrcp.f32 %v155_v38 }
 0x236   :  { %309 = vmatmul.msk.f32.vlgmr.msra.gmra.mxu2 %vm163_vm2, %v162_v39 }
 0x23b   :  { %v326_v40 = vpop.eup %325 }
 0x23c   :  { %v161_v41 = vmul.f32 %v326_v40, %v322_v34 }
 0x23e   :  { %308 = vmatmul.msk.f32.vlgmr.msra.gmra.mxu1 %vm163_vm2, %v161_v41 }
 0x2b9   :  { %v207_v50 = vpop.f32.mrf.mxu2 }
 0x2ba   :  { %v217_v51 = vperm.slane %v207_v50, %v212_v47 }
 0x2bb   :  { %v184_v52 = vpop.f32.mrf.mxu1 }
 0x2bc   :  { %v218_v54 = vrot.slane %v217_v51, 4  ;;  %v213_v55 = vperm.slane %v184_v52, %v212_v47 }
 0x2be   :  { %v220_v56 = vsel %vm219_vm3, %v218_v54, %v213_v55  ;;  %v221_v57 = vrot.slane %v213_v55, 4 }
 0x2bf   :  { %v226_v58 = vperm.slane %v220_v56, %v225_v53 }
 0x2c0   :  { %v222_v59 = vsel %vm219_vm3, %v217_v51, %v221_v57 }
 0x2c1   :  { %v230_v60 = vperm.slane %v222_v59, %v225_v53  ;;  %v231_v61 = vrot.slane %v226_v58, 4 }
 0x2c3   :  { %240 = vrot.lane.b32.xlu1 %v230_v60, %s355_s12  ;;  %v232_v62 = vsel %vm219_vm3, 0.0, %v231_v61  ;;  %v233_v63 = vrot.slane %v230_v60, 4  ;;  %s358_s12 = smov [#allocation2]  }
 0x2c4   :  { %236 = vrot.lane.b32.xlu0 %v232_v62, %s356_s13  ;;  %s295_s13 = sshll.u32 %s358_s12, 4  ;;  %s296_s13 = int_to_ptr.vmem [resolvable:$true] %s295_s13 }
 0x2c5   :  { %v234_v0 = vsel %vm219_vm3, 0.0, %v233_v63 }
 0x2c6   :  { %244 = vrot.lane.b32.xlu2 %v234_v0, %s357_s14 }
 0x320   :  { %v245_v17 = vpop.permute.xlu2 %244 }
 0x335   :  { %v241_v15 = vpop.permute.xlu1 %240 }
 0x336   :  { %v237_v14 = vpop.permute.xlu0 %236 }
 0x337   :  { %v247_v16 = vsel %vm24_vm0, %v226_v58, %v237_v14 }
 0x338   :  { %v249_v18 = vsel %vm248_vm4, %v247_v16, %v241_v15 }
 0x339   :  { %v251_v19 = vsel %vm250_vm5, %v249_v18, %v245_v17 }
 0x33a   :  { %284 = vmatmul.f32.vlgmr.msra.gmra.mxu3 %v251_v19 }
 0x3bd   :  { %v285_v20 = vpop.f32.mrf.mxu3 }
 0x3be   :  { %289 = vst.msk [vmem:[#allocation2] sm:$0x3] %vm288_vm6, %v285_v20 }
 0x3bf   :  { %300 = dma.vmem_to_hbm [thread:$0]  %s296_s13, 32, %s298_s16, [#allocation3]  }
 0x3c0   :  { %351 = dma.done.wait [#allocation3], 32  }
 0x3c1   :  { %352 = vsyncadd [#allocation3], 4294967264 }
 0x3c2   :  { %305 = vsyncpa [#allocation3], 1 }

</bundles_post_ra>
